<compile_context>
chip_gen: v7x
topology: tpu7x:2x2x1
jax: 0.10.0
libtpu: 0.0.40
codegen_flags: <defaults>
</compile_context>

<pallas_src>
import functools

import jax
import jax.numpy as jnp
import numpy as np
from jax.experimental import pallas as pl
from jax.experimental.pallas import tpu as pltpu


def _round_up(v, m):
    return (v + m - 1) // m * m


def _num_tensorcores():
    """Best-effort count of TensorCores one Pallas kernel instance can use."""
    try:
        kind = jax.devices()[0].device_kind.lower()
    except Exception:
        return 1
    if any(tag in kind for tag in ("v4", "v5p", "v7")):
        return 2          # megacore chips: 2 TensorCores per device
    return 1              # v2/v3/v5e/v6e: 1 TensorCore per device


def _gram_kernel(x_ref, y_ref, g_ref, *, operand_dtype):
    """Accumulate the Gram matrix of the stacked, batch-centered tiles.

    x_ref, y_ref : (B, tile)      input feature chunks (native dtype)
    g_ref        : (2B, 2B) f32   resident accumulator; g = z @ z.T with
                                  z = [center(x); center(y)].
    """
    c = pl.program_id(1)

    @pl.when(c == 0)
    def _init():
        g_ref[...] = jnp.zeros_like(g_ref)

    x = x_ref[...].astype(jnp.float32)
    y = y_ref[...].astype(jnp.float32)

    # Tile-local batch centering (exact: the per-column batch mean only
    # involves the B rows of this block).
    xc = x - jnp.mean(x, axis=0, keepdims=True)
    yc = y - jnp.mean(y, axis=0, keepdims=True)

    # One fused MXU contraction (K = tile on the lane axis) for both Grams:
    # the two diagonal (B, B) blocks of z @ z.T are Gx and Gy.
    z = jnp.concatenate([xc, yc], axis=0)            # (2B, tile)
    if operand_dtype is not None:
        z = z.astype(operand_dtype)
    dn = (((1,), (1,)), ((), ()))
    g_ref[...] += jax.lax.dot_general(z, z, dn,
                                      preferred_element_type=jnp.float32)


def diff_loss(input1, input2, *, lane_tile=None, num_partitions=None,
              operand_dtype=None):
    # TODO(synk): forward only; wrap in jax.custom_vjp (with the Gram-diagonal
    # norms under lax.stop_gradient, matching PyTorch's .detach()) if this
    # loss needs to be differentiated.
    B = input1.shape[0]
    x = input1.reshape(B, -1)
    y = input2.reshape(B, -1)
    D1, D2 = x.shape[1], y.shape[1]
    Dmax = max(D1, D2)
    itemsize = max(x.dtype.itemsize, y.dtype.itemsize)

    if num_partitions is None:
        num_partitions = _num_tensorcores()

    # Lane-tile selection: keep 2 inputs x 2 pipeline buffers within ~8 MiB of
    # VMEM (-> ~4 MiB of HBM reads per grid step), big enough to amortize the
    # ~0.35 us fixed per-grid-step overhead on every generation.
    if lane_tile is None:
        in_buf_budget = 8 * 1024 * 1024
        lane_tile = in_buf_budget // (2 * 2 * B * itemsize)
        lane_tile = max(512, (lane_tile // 128) * 128)
    tile = min(lane_tile, _round_up(Dmax, 128))
    tile = max(128, (tile // 128) * 128)

    n_chunks = pl.cdiv(Dmax, tile)
    P = max(1, min(num_partitions, n_chunks))        # megacore partitions
    n_chunks = _round_up(n_chunks, P)
    NC = n_chunks // P                               # chunks per partition
    Dp = n_chunks * tile

    # Zero-pad the feature axis; zero columns stay zero after centering and
    # contribute exactly 0 to the Gram matrix.
    xp = jnp.pad(x, ((0, 0), (0, Dp - D1))) if Dp != D1 else x
    yp = jnp.pad(y, ((0, 0), (0, Dp - D2))) if Dp != D2 else y

    G = 2 * B                                        # fused Gram size

    # Explicit scoped-VMEM budget: double-buffered inputs + f32 compute
    # temporaries (centered tiles + stacked MXU operand) + headroom.  Needed
    # for large tiles on v5e (16 MiB default scoped VMEM); well under every
    # chip's physical VMEM.
    in_bytes = 2 * 2 * B * tile * itemsize
    tmp_bytes = 6 * B * tile * 4
    vmem_limit = int(min(30 * 1024 * 1024,
                         max(16 * 1024 * 1024,
                             in_bytes + tmp_bytes + 4 * 1024 * 1024)))

    g_parts = pl.pallas_call(
        functools.partial(_gram_kernel, operand_dtype=operand_dtype),
        out_shape=jax.ShapeDtypeStruct((P, G, G), jnp.float32),
        grid_spec=pltpu.PrefetchScalarGridSpec(
            num_scalar_prefetch=0,
            grid=(P, NC),
            in_specs=[
                pl.BlockSpec((B, tile), lambda p, c: (0, p * NC + c)),
                pl.BlockSpec((B, tile), lambda p, c: (0, p * NC + c)),
            ],
            out_specs=pl.BlockSpec((None, G, G), lambda p, c: (p, 0, 0)),
        ),
        compiler_params=pltpu.CompilerParams(
            dimension_semantics=("parallel", "arbitrary"),
            vmem_limit_bytes=vmem_limit),
        cost_estimate=pl.CostEstimate(
            flops=2 * G * G * Dp + 6 * B * Dp,
            transcendentals=0,
            bytes_accessed=2 * B * Dp * itemsize + 4 * P * G * G),
    )(xp, yp)

    # Tiny O(B^2) epilogue in plain JAX.
    g = jnp.sum(g_parts, axis=0)                     # (2B, 2B)
    gx = g[:B, :B]
    gy = g[B:, B:]
    # Row L2 norms of the centered inputs = sqrt of the Gram diagonals.
    sx = 1.0 / (jnp.sqrt(jnp.diagonal(gx)) + 1e-6)
    sy = 1.0 / (jnp.sqrt(jnp.diagonal(gy)) + 1e-6)
    gxn = gx * sx[:, None] * sx[None, :]
    gyn = gy * sy[:, None] * sy[None, :]
    # mean((X_l2^T Y_l2)^2) = <Gx_n, Gy_n>_F / (D1*D2); divisor computed in
    # Python double precision (exact for any realistic feature-map size).
    return (jnp.sum(gxn * gyn) / (float(D1) * float(D2))).astype(jnp.float32)


def diff_loss_ref(input1, input2):
    # Pure-JAX reference mirroring the PyTorch forward exactly.
    B = input1.shape[0]
    x = input1.reshape(B, -1).astype(jnp.float32)
    y = input2.reshape(B, -1).astype(jnp.float32)
    x = x - jnp.mean(x, axis=0, keepdims=True)
    y = y - jnp.mean(y, axis=0, keepdims=True)
    x = x / (jnp.linalg.norm(x, axis=1, keepdims=True) + 1e-6)
    y = y / (jnp.linalg.norm(y, axis=1, keepdims=True) + 1e-6)
    return jnp.mean((x.T @ y) ** 2)


if __name__ == "__main__":
    key = jax.random.PRNGKey(0)
    k1, k2 = jax.random.split(key)
    # NCHW inputs, like the PyTorch module would receive from a conv stack.
    input1 = jax.random.normal(k1, (2, 4, 16, 16), dtype=jnp.float32)
    input2 = jax.random.normal(k2, (2, 4, 16, 16), dtype=jnp.float32)

    out = diff_loss(input1, input2)
    out = jax.block_until_ready(out)

    ref = diff_loss_ref(input1, input2)
    assert np.allclose(np.asarray(out), np.asarray(ref), rtol=1e-4, atol=1e-6), (
        float(out), float(ref))
    print("KERNEL_OK")
</pallas_src>

<mosaic_0001>
module attributes {stable_mosaic.version = 11 : i64} {
  func.func @_gram_kernel(%arg0: i32, %arg1: i32, %arg2: memref<2x1024xf32, #tpu.memory_space<vmem>>, %arg3: memref<2x1024xf32, #tpu.memory_space<vmem>>, %arg4: memref<1x4x4xf32, #tpu.memory_space<vmem>>) attributes {dimension_semantics = [#tpu.dimension_semantics<parallel>, #tpu.dimension_semantics<arbitrary>], iteration_bounds = array<i64: 1, 1>, scalar_prefetch = 0 : i64, scratch_operands = 0 : i64, tpu.core_type = #tpu.core_type<tc>, window_params = [{transform_indices = @transform_0, window_bounds = array<i64: 2, 1024>}, {transform_indices = @transform_1, window_bounds = array<i64: 2, 1024>}, {transform_indices = @transform_2, window_bounds = array<i64: 1, 4, 4>}]} {
    %c0_i32 = arith.constant 0 : i32
    %0 = arith.cmpi eq, %arg1, %c0_i32 : i32
    %1 = arith.extui %0 : i1 to i32
    %c0_i32_0 = arith.constant 0 : i32
    %2 = arith.cmpi ne, %1, %c0_i32_0 : i32
    scf.if %2 {
      %cst_14 = arith.constant 0.000000e+00 : f32
      %25 = vector.broadcast %cst_14 : f32 to vector<4x4xf32>
      %c0_15 = arith.constant 0 : index
      %c0_16 = arith.constant 0 : index
      %c0_17 = arith.constant 0 : index
      %26 = vector.load %arg4[%c0_15, %c0_16, %c0_17] : memref<1x4x4xf32, #tpu.memory_space<vmem>>, vector<1x4x4xf32>
      %27 = vector.shape_cast %26 : vector<1x4x4xf32> to vector<4x4xf32>
      %28 = vector.shape_cast %25 : vector<4x4xf32> to vector<1x4x4xf32>
      tpu.vector_store %arg4[%c0_15, %c0_16, %c0_17], %28 {strides = array<i32>} : memref<1x4x4xf32, #tpu.memory_space<vmem>>, vector<1x4x4xf32>,
    } else {
    }
    %c0 = arith.constant 0 : index
    %c0_1 = arith.constant 0 : index
    %3 = vector.load %arg2[%c0, %c0_1] : memref<2x1024xf32, #tpu.memory_space<vmem>>, vector<2x1024xf32>
    %c0_2 = arith.constant 0 : index
    %c0_3 = arith.constant 0 : index
    %4 = vector.load %arg3[%c0_2, %c0_3] : memref<2x1024xf32, #tpu.memory_space<vmem>>, vector<2x1024xf32>
    %cst = arith.constant dense<0.000000e+00> : vector<1024xf32>
    %5 = vector.multi_reduction <add>, %3, %cst [0] : vector<2x1024xf32> to vector<1024xf32>
    %6 = vector.shape_cast %5 : vector<1024xf32> to vector<1x1024xf32>
    %cst_4 = arith.constant 2.000000e+00 : f32
    %7 = vector.broadcast %cst_4 : f32 to vector<1x1024xf32>
    %8 = arith.divf %6, %7 : vector<1x1024xf32>
    %9 = vector.broadcast %8 : vector<1x1024xf32> to vector<2x1024xf32>
    %10 = arith.subf %3, %9 : vector<2x1024xf32>
    %cst_5 = arith.constant dense<0.000000e+00> : vector<1024xf32>
    %11 = vector.multi_reduction <add>, %4, %cst_5 [0] : vector<2x1024xf32> to vector<1024xf32>
    %12 = vector.shape_cast %11 : vector<1024xf32> to vector<1x1024xf32>
    %cst_6 = arith.constant 2.000000e+00 : f32
    %13 = vector.broadcast %cst_6 : f32 to vector<1x1024xf32>
    %14 = arith.divf %12, %13 : vector<1x1024xf32>
    %15 = vector.broadcast %14 : vector<1x1024xf32> to vector<2x1024xf32>
    %16 = arith.subf %4, %15 : vector<2x1024xf32>
    %17 = tpu.concatenate %10, %16 in 0 : vector<2x1024xf32>, vector<2x1024xf32> -> vector<4x1024xf32>
    %c0_7 = arith.constant 0 : index
    %c0_8 = arith.constant 0 : index
    %c0_9 = arith.constant 0 : index
    %18 = vector.load %arg4[%c0_7, %c0_8, %c0_9] : memref<1x4x4xf32, #tpu.memory_space<vmem>>, vector<1x4x4xf32>
    %19 = vector.shape_cast %18 : vector<1x4x4xf32> to vector<4x4xf32>
    %cst_10 = arith.constant dense<0.000000e+00> : vector<4x4xf32>
    %20 = tpu.matmul %17, %17, %cst_10 {dimension_numbers = #tpu.dot_dimension_numbers<[1], [1], [0], [0], [0, 0, 1, 0], [], []>} : vector<4x1024xf32>, vector<4x1024xf32>, vector<4x4xf32> -> vector<4x4xf32>
    %21 = arith.addf %19, %20 : vector<4x4xf32>
    %c0_11 = arith.constant 0 : index
    %c0_12 = arith.constant 0 : index
    %c0_13 = arith.constant 0 : index
    %22 = vector.load %arg4[%c0_11, %c0_12, %c0_13] : memref<1x4x4xf32, #tpu.memory_space<vmem>>, vector<1x4x4xf32>
    %23 = vector.shape_cast %22 : vector<1x4x4xf32> to vector<4x4xf32>
    %24 = vector.shape_cast %21 : vector<4x4xf32> to vector<1x4x4xf32>
    tpu.vector_store %arg4[%c0_11, %c0_12, %c0_13], %24 {strides = array<i32>} : memref<1x4x4xf32, #tpu.memory_space<vmem>>, vector<1x4x4xf32>,
    return
  }
  func.func @transform_0(%arg0: i32, %arg1: i32) -> (i32, i32) {
    %c1_i32 = arith.constant 1 : i32
    %0 = arith.muli %arg0, %c1_i32 : i32
    %1 = arith.addi %0, %arg1 : i32
    %c0_i32 = arith.constant 0 : i32
    %c0_i32_0 = arith.constant 0 : i32
    return %c0_i32, %1 : i32, i32
  }
  func.func @transform_1(%arg0: i32, %arg1: i32) -> (i32, i32) {
    %c1_i32 = arith.constant 1 : i32
    %0 = arith.muli %arg0, %c1_i32 : i32
    %1 = arith.addi %0, %arg1 : i32
    %c0_i32 = arith.constant 0 : i32
    %c0_i32_0 = arith.constant 0 : i32
    return %c0_i32, %1 : i32, i32
  }
  func.func @transform_2(%arg0: i32, %arg1: i32) -> (i32, i32, i32) {
    %c0_i32 = arith.constant 0 : i32
    %c0_i32_0 = arith.constant 0 : i32
    %c0_i32_1 = arith.constant 0 : i32
    return %arg0, %c0_i32, %c0_i32_0 : i32, i32, i32
  }
}

</mosaic_0001>

<bundles_post_ra>
// kernel: tpu_custom_call.1
= control target key start
LH: loop header
LB: loop body
LE: loop exit
PB: predicated region body
PF: predicated region fallthrough
CT: control target
= control target key end

     0   :  { %7 = vsyncpa [#allocation3], 0  ;;  %s995_s0 = inlined_call_operand.hbm [shape: f32[2,1024], index: 0, kind: input, shape index: {}]   ;;  %s996_s1 = inlined_call_operand.hbm [shape: f32[2,1024], index: 1, kind: input, shape index: {}]   ;;  %s997_s2 = inlined_call_operand.hbm [shape: f32[1,4,4], index: 2, kind: output, shape index: {}]  }
   0x1   :  { %8 = vsyncpa [#allocation6], 0 }
   0x2   :  { %9 = vsyncpa [#allocation4], 0  ;;  %s845_s9 = smov [#allocation2]   ;;  %s846_s11 = smov [#allocation5]  }
   0x3   :  { %s20_s10 = sshll.u32 %s845_s9, 4  ;;  %s34_s12 = sshll.u32 %s846_s11, 4  ;;  %s21_s10 = int_to_ptr.vmem [resolvable:$true] %s20_s10  ;;  %s35_s12 = int_to_ptr.vmem [resolvable:$true] %s34_s12 }
   0x4   :  { %s773_s15 = scalar_lea.hbm %s995_s0, 256 }
   0x5   :  { %p774_p0 = scmp.ne.s32.totalorder %s995_s0, %s773_s15  ;;  %p777_p1 = scmp.lt.u32.totalorder %s773_s15, %s995_s0 }
   0x7   :  { %p779_p2 = pnand %p777_p1, %p774_p0 }
   0x9   :  { %782 = shalt.err (!%p779_p2)
}
   0xa   :  { %s783_s20 = scalar_lea.vmem %s21_s10, 256  ;;  %p788_p4 = scmp.lt.s32.totalorder %s21_s10, %s21_s10 }
   0xb   :  { %p784_p3 = scmp.ne.s32.totalorder %s21_s10, %s783_s20  ;;  %p789_p5 = scmp.lt.s32.totalorder %s783_s20, %s783_s20 }
   0xd   :  { %p790_p6 = por %p789_p5, %p788_p4 }
   0xf   :  { %p791_p7 = pnand %p790_p6, %p784_p3 }
  0x11   :  { %794 = shalt.err (!%p791_p7)
}
  0x12   :  { %23 = dma.hbm_to_vmem [thread:$0]  %s995_s0, 256, %s21_s10, [#allocation3]  }
  0x13   :  { %s795_s25 = scalar_lea.hbm %s996_s1, 256 }
  0x14   :  { %p796_p8 = scmp.ne.s32.totalorder %s996_s1, %s795_s25  ;;  %p799_p9 = scmp.lt.u32.totalorder %s795_s25, %s996_s1 }
  0x16   :  { %p801_p10 = pnand %p799_p9, %p796_p8 }
  0x18   :  { %804 = shalt.err (!%p801_p10)
}
  0x19   :  { %s805_s30 = scalar_lea.vmem %s35_s12, 256  ;;  %p810_p12 = scmp.lt.s32.totalorder %s35_s12, %s35_s12 }
  0x1a   :  { %p806_p11 = scmp.ne.s32.totalorder %s35_s12, %s805_s30  ;;  %p811_p13 = scmp.lt.s32.totalorder %s805_s30, %s805_s30 }
  0x1c   :  { %p812_p0 = por %p811_p13, %p810_p12 }
  0x1e   :  { %p813_p1 = pnand %p812_p0, %p806_p11 }
  0x20   :  { %816 = shalt.err (!%p813_p1)
}
  0x21   :  { %37 = dma.hbm_to_vmem [thread:$0]  %s996_s1, 256, %s35_s12, [#allocation6]  }
  0x22   :  { %839 = dma.done.wait [#allocation3], 256  }
  0x23   :  { %840 = vsyncadd [#allocation3], 4294967040 }
  0x24   :  { %841 = dma.done.wait [#allocation6], 256  }
  0x25   :  { %842 = vsyncadd [#allocation6], 4294967040  ;;  %vm52_vm0 = vcmask 27648   ;;  %v64_v0 = vlaneseq  ;;  %v847_v1 = vmov 0.0   ;;  %v848_v2 = vmov 1983009808  }
  0x26   :  { %53 = vst.msk [vmem:[#allocation7] sm:$0xf] %vm52_vm0, %v847_v1  ;;  %v62_v3 = vunpack.c.l.s4 %v848_v2  ;;  %v892_v7 = vld [vmem:[#allocation2] sm:$0xff]  ;;  %v894_v8 = vld [vmem:[#allocation5] sm:$0xff]  ;;  %vm102_vm1 = vcmask 1041408   ;;  %v896_v9 = vld [vmem:[#allocation2 + $0x8] sm:$0xff] }
  0x27   :  { %v65_v4 = vshrl.u32 %v64_v0, 7  ;;  %v60_v10 = vcombine.high %v892_v7, %v892_v7  ;;  %v216_v12 = vcombine.high %v894_v8, %v894_v8  ;;  %v906_v14 = vld [vmem:[#allocation5 + $0x8] sm:$0xff]  ;;  %v77_v15 = vcombine.high %v896_v9, %v896_v9  ;;  %s849_s1 = smov [#allocation7]  }
  0x28   :  { %v63_v5 = vunpack.c.0.s8 %v62_v3  ;;  %v233_v17 = vcombine.high %v906_v14, %v906_v14  ;;  %s754_s4 = sshll.u32 %s849_s1, 4  ;;  %s755_s4 = int_to_ptr.vmem [resolvable:$true] %s754_s4 }
  0x29   :  { %s817_s5 = scalar_lea.vmem %s755_s4, 64  ;;  %p822_p3 = scmp.lt.s32.totalorder %s755_s4, %s755_s4 }
  0x2a   :  { %v890_v6 = vsub.s32 %v63_v5, %v65_v4  ;;  %p818_p2 = scmp.ne.s32.totalorder %s755_s4, %s817_s5  ;;  %p823_p4 = scmp.lt.s32.totalorder %s817_s5, %s817_s5 }
  0x2c   :  { %v67_v11 = vrot.slane %v892_v7, %v890_v6  ;;  %v223_v13 = vrot.slane %v894_v8, %v890_v6  ;;  %v912_v16 = vrot.slane %v896_v9, %v890_v6  ;;  %v918_v18 = vrot.slane %v906_v14, %v890_v6  ;;  %p824_p5 = por %p823_p4, %p822_p3 }
  0x2d   :  { %v74_v19 = vrot.slane %v60_v10, %v890_v6  ;;  %v230_v22 = vrot.slane %v216_v12, %v890_v6  ;;  %v925_v26 = vrot.slane %v77_v15, %v890_v6 }
  0x2e   :  { %v75_v20 = vcombine.high %v67_v11, %v67_v11  ;;  %v103_v21 = vsel %vm102_vm1, %v67_v11, 0.0  ;;  %v231_v24 = vcombine.high %v223_v13, %v223_v13  ;;  %v258_v25 = vsel %vm102_vm1, %v223_v13, 0.0  ;;  %p825_p6 = pnand %p824_p5, %p818_p2 }
  0x2f   :  { %v104_v23 = vrot.slane %v103_v21, 4  ;;  %v76_v27 = vcombine.high %v74_v19, %v74_v19  ;;  %v117_v29 = vsel %vm102_vm1, %v74_v19, 0.0  ;;  %v232_v30 = vcombine.high %v230_v22, %v230_v22 }
  0x30   :  { %v110_v28 = vsel %vm102_vm1, %v75_v20, 0.0  ;;  %v118_v33 = vrot.slane %v117_v29, 4  ;;  %v259_v34 = vrot.slane %v258_v25, 4  ;;  %v265_v36 = vsel %vm102_vm1, %v231_v24, 0.0 }
  0x31   :  { %v105_v31 = vadd.f32 %v104_v23, %v103_v21  ;;  %v111_v32 = vrot.slane %v110_v28, 4  ;;  %v124_v35 = vsel %vm102_vm1, %v76_v27, 0.0  ;;  %v272_v37 = vsel %vm102_vm1, %v230_v22, 0.0 }
  0x32   :  { %v279_v38 = vsel %vm102_vm1, %v232_v30, 0.0  ;;  %v119_v41 = vadd.f32 %v118_v33, %v117_v29  ;;  %v125_v42 = vrot.slane %v124_v35, 4  ;;  %v260_v43 = vadd.f32 %v259_v34, %v258_v25 }
  0x33   :  { %v106_v39 = vrot.slane %v105_v31, 2  ;;  %v112_v40 = vadd.f32 %v111_v32, %v110_v28  ;;  %v266_v44 = vrot.slane %v265_v36, 4  ;;  %v273_v45 = vrot.slane %v272_v37, 4 }
  0x34   :  { %v280_v46 = vrot.slane %v279_v38, 4  ;;  %v120_v49 = vrot.slane %v119_v41, 2  ;;  %v126_v50 = vadd.f32 %v125_v42, %v124_v35  ;;  %v261_v51 = vrot.slane %v260_v43, 2 }
  0x35   :  { %v107_v47 = vadd.f32 %v106_v39, %v105_v31  ;;  %v113_v48 = vrot.slane %v112_v40, 2  ;;  %v267_v52 = vadd.f32 %v266_v44, %v265_v36  ;;  %v274_v53 = vadd.f32 %v273_v45, %v272_v37 }
  0x36   :  { %v281_v54 = vadd.f32 %v280_v46, %v279_v38  ;;  %v121_v57 = vadd.f32 %v120_v49, %v119_v41  ;;  %v127_v58 = vrot.slane %v126_v50, 2  ;;  %v262_v59 = vadd.f32 %v261_v51, %v260_v43 }
  0x37   :  { %v108_v55 = vrot.slane %v107_v47, 1  ;;  %v114_v56 = vadd.f32 %v113_v48, %v112_v40  ;;  %v268_v60 = vrot.slane %v267_v52, 2  ;;  %v275_v61 = vrot.slane %v274_v53, 2 }
  0x38   :  { %v282_v62 = vrot.slane %v281_v54, 2  ;;  %v122_v1 = vrot.slane %v121_v57, 1  ;;  %v128_v2 = vadd.f32 %v127_v58, %v126_v50  ;;  %v263_v3 = vrot.slane %v262_v59, 1 }
  0x39   :  { %v109_v63 = vadd.f32 %v108_v55, %v107_v47  ;;  %v115_v0 = vrot.slane %v114_v56, 1  ;;  %v269_v4 = vadd.f32 %v268_v60, %v267_v52  ;;  %v276_v5 = vadd.f32 %v275_v61, %v274_v53 }
  0x3a   :  { %v283_v10 = vadd.f32 %v282_v62, %v281_v54  ;;  %v123_v12 = vadd.f32 %v122_v1, %v121_v57  ;;  %v129_v13 = vrot.slane %v128_v2, 1  ;;  %v264_v19 = vadd.f32 %v263_v3, %v262_v59 }
  0x3b   :  { %v116_v11 = vadd.f32 %v115_v0, %v114_v56  ;;  %v160_v15 = vmul.f32 0.5, %v109_v63  ;;  %v270_v20 = vrot.slane %v269_v4, 1  ;;  %v277_v21 = vrot.slane %v276_v5, 1 }
  0x3c   :  { %v284_v22 = vrot.slane %v283_v10, 1  ;;  %v130_v23 = vadd.f32 %v129_v13, %v128_v2  ;;  %v162_v25 = vmul.f32 0.5, %v123_v12  ;;  %v92_v27 = vcombine.high %v912_v16, %v912_v16 }
  0x3d   :  { %v161_v24 = vmul.f32 0.5, %v116_v11  ;;  %v271_v28 = vadd.f32 %v270_v20, %v269_v4  ;;  %v278_v29 = vadd.f32 %v277_v21, %v276_v5  ;;  %v314_v31 = vmul.f32 0.5, %v264_v19 }
  0x3e   :  { %v285_v30 = vadd.f32 %v284_v22, %v283_v10  ;;  %v163_v32 = vmul.f32 0.5, %v130_v23  ;;  %v93_v34 = vcombine.high %v925_v26, %v925_v26  ;;  %v131_v35 = vsel %vm102_vm1, %v912_v16, 0.0 }
  0x3f   :  { %v176_v33 = vcombine.low %v160_v15, %v161_v24  ;;  %v315_v36 = vmul.f32 0.5, %v271_v28  ;;  %v316_v37 = vmul.f32 0.5, %v278_v29  ;;  %v132_v39 = vrot.slane %v131_v35, 4 }
  0x40   :  { %v317_v38 = vmul.f32 0.5, %v285_v30  ;;  %v177_v40 = vcombine.low %v162_v25, %v163_v32  ;;  %v138_v42 = vsel %vm102_vm1, %v92_v27, 0.0  ;;  %v145_v43 = vsel %vm102_vm1, %v925_v26, 0.0 }
  0x41   :  { %v184_v41 = vrot.slane %v176_v33, %v890_v6  ;;  %v330_v44 = vcombine.low %v314_v31, %v315_v36  ;;  %v133_v46 = vadd.f32 %v132_v39, %v131_v35  ;;  %v139_v47 = vrot.slane %v138_v42, 4 }
  0x42   :  { %v331_v45 = vcombine.low %v316_v37, %v317_v38  ;;  %v191_v48 = vrot.slane %v177_v40, %v890_v6  ;;  %v146_v49 = vrot.slane %v145_v43, 4  ;;  %v152_v16 = vsel %vm102_vm1, %v93_v34, 0.0 }
  0x43   :  { %v247_v50 = vrot.slane %v233_v17, %v890_v6  ;;  %v338_v51 = vrot.slane %v330_v44, %v890_v6  ;;  %v134_v53 = vrot.slane %v133_v46, 2  ;;  %v140_v26 = vadd.f32 %v139_v47, %v138_v42 }
  0x44   :  { %v345_v52 = vrot.slane %v331_v45, %v890_v6  ;;  %v192_v54 = vcombine.low %v184_v41, %v191_v48  ;;  %v147_v55 = vadd.f32 %v146_v49, %v145_v43  ;;  %v153_v56 = vrot.slane %v152_v16, 4 }
  0x45   :  { %v248_v57 = vcombine.high %v918_v18, %v918_v18  ;;  %v135_v59 = vadd.f32 %v134_v53, %v133_v46  ;;  %v141_v60 = vrot.slane %v140_v26, 2  ;;  %v249_v61 = vcombine.high %v247_v50, %v247_v50 }
  0x46   :  { %v346_v58 = vcombine.low %v338_v51, %v345_v52  ;;  %v212_v62 = vsub.f32 %v892_v7, %v192_v54  ;;  %v148_v63 = vrot.slane %v147_v55, 2  ;;  %v154_v17 = vadd.f32 %v153_v56, %v152_v16 }
  0x47   :  { %v286_v0 = vsel %vm102_vm1, %v918_v18, 0.0  ;;  %v136_v2 = vrot.slane %v135_v59, 1  ;;  %v142_v3 = vadd.f32 %v141_v60, %v140_v26  ;;  %v293_v38 = vsel %vm102_vm1, %v248_v57, 0.0 }
  0x48   :  { %v366_v1 = vsub.f32 %v894_v8, %v346_v58  ;;  %v287_v4 = vrot.slane %v286_v0, 4  ;;  %v377_v5 = vrot.slane %v212_v62, %v890_v6  ;;  %v370_v10 = vcombine.high %v212_v62, %v212_v62 }
  0x49   :  { %v149_v11 = vadd.f32 %v148_v63, %v147_v55  ;;  %v155_v12 = vrot.slane %v154_v17, 2  ;;  %v137_v19 = vadd.f32 %v136_v2, %v135_v59  ;;  %v143_v7 = vrot.slane %v142_v3, 1 }
  0x4a   :  { %v414_v13 = vcombine.low %v366_v1, %v366_v1  ;;  %v428_v15 = vrot.slane %v366_v1, %v890_v6  ;;  %v385_v20 = vcombine.high %v377_v5, %v377_v5  ;;  %v384_v21 = vrot.slane %v370_v10, %v890_v6 }
  0x4b   :  { %v150_v22 = vrot.slane %v149_v11, 1  ;;  %v156_v18 = vadd.f32 %v155_v12, %v154_v17  ;;  %v144_v24 = vadd.f32 %v143_v7, %v142_v3  ;;  %v164_v25 = vmul.f32 0.5, %v137_v19 }
  0x4c   :  { %v421_v8 = vrot.slane %v414_v13, %v890_v6  ;;  %v430_v23 = vcombine.high %v428_v15, %v428_v15  ;;  %v386_v27 = vcombine.high %v384_v21, %v384_v21  ;;  %v458_v28 = vsel %vm102_vm1, %v384_v21, %v428_v15 }
  0x4d   :  { %v151_v29 = vadd.f32 %v150_v22, %v149_v11  ;;  %v157_v30 = vrot.slane %v156_v18, 1  ;;  %v165_v33 = vmul.f32 0.5, %v144_v24  ;;  %v288_v34 = vadd.f32 %v287_v4, %v286_v0 }
  0x4e   :  { %v429_v31 = vcombine.high %v421_v8, %v421_v8  ;;  %v456_v32 = vsel %vm102_vm1, %v377_v5, %v421_v8  ;;  %v459_v35 = vsel %vm102_vm1, %v386_v27, %v430_v23  ;;  %v294_v41 = vrot.slane %v293_v38, 4 }
  0x4f   :  { %v158_v36 = vadd.f32 %v157_v30, %v156_v18  ;;  %v166_v37 = vmul.f32 0.5, %v151_v29  ;;  %535 = vmatprep.subr.mxu1 %v459_v35  ;;  %599 = vmatprep.mubr.f32.mxu1 %v459_v35  ;;  %v289_v40 = vrot.slane %v288_v34, 2  ;;  %v193_v43 = vcombine.low %v164_v25, %v165_v33 }
  0x50   :  { %v457_v39 = vsel %vm102_vm1, %v385_v20, %v429_v31  ;;  %536 = vmatpush1.xpose.msra.mxu1 %v458_v28  ;;  %v300_v44 = vsel %vm102_vm1, %v247_v50, 0.0  ;;  %v307_v45 = vsel %vm102_vm1, %v249_v61, 0.0  ;;  %v295_v47 = vadd.f32 %v294_v41, %v293_v38  ;;  %v464_v41 = vld [vmem:[#allocation7] sm:$0xf] }
  0x51   :  { %465 = vmatprep.subr.mxu0 %v457_v39  ;;  %v167_v42 = vmul.f32 0.5, %v158_v36  ;;  %529 = vmatprep.mubr.f32.mxu0 %v457_v39  ;;  %v290_v46 = vadd.f32 %v289_v40, %v288_v34  ;;  %v301_v48 = vrot.slane %v300_v44, 4  ;;  %v308_v16 = vrot.slane %v307_v45, 4 }
  0x52   :  { %466 = vmatpush1.xpose.msra.mxu0 %v456_v32  ;;  %v296_v52 = vrot.slane %v295_v47, 2  ;;  %v201_v26 = vrot.slane %v193_v43, %v890_v6 }
  0x53   :  { %v194_v49 = vcombine.low %v166_v37, %v167_v42  ;;  %v291_v51 = vrot.slane %v290_v46, 1  ;;  %v302_v53 = vadd.f32 %v301_v48, %v300_v44  ;;  %600 = vmatmul.mubr.f32.vlgmr.msra.gmra.mrb[0].mxu1 %v458_v28  ;;  %v309_v55 = vadd.f32 %v308_v16, %v307_v45 }
  0x54   :  { %v297_v56 = vadd.f32 %v296_v52, %v295_v47 }
  0x55   :  { %530 = vmatmul.mubr.f32.vlgmr.msra.gmra.mrb[0].mxu0 %v456_v32  ;;  %v208_v54 = vrot.slane %v194_v49, %v890_v6  ;;  %v292_v50 = vadd.f32 %v291_v51, %v290_v46  ;;  %v303_v57 = vrot.slane %v302_v53, 2  ;;  %v310_v58 = vrot.slane %v309_v55, 2 }
  0x56   :  { %v298_v59 = vrot.slane %v297_v56, 1 }
  0x57   :  { %v304_v60 = vadd.f32 %v303_v57, %v302_v53  ;;  %v209_v61 = vcombine.low %v201_v26, %v208_v54  ;;  %v311_v62 = vadd.f32 %v310_v58, %v309_v55  ;;  %v318_v0 = vmul.f32 0.5, %v292_v50 }
  0x58   :  { %v299_v63 = vadd.f32 %v298_v59, %v297_v56 }
  0x59   :  { %v305_v17 = vrot.slane %v304_v60, 1  ;;  %v312_v1 = vrot.slane %v311_v62, 1  ;;  %v213_v4 = vsub.f32 %v896_v9, %v209_v61 }
  0x5a   :  { %v319_v3 = vmul.f32 0.5, %v299_v63 }
  0x5b   :  { %v306_v2 = vadd.f32 %v305_v17, %v304_v60  ;;  %v313_v5 = vadd.f32 %v312_v1, %v311_v62  ;;  %v387_v19 = vcombine.high %v213_v4, %v213_v4  ;;  %v394_v18 = vrot.slane %v213_v4, %v890_v6 }
  0x5c   :  { %v347_v11 = vcombine.low %v318_v0, %v319_v3 }
  0x5d   :  { %v320_v10 = vmul.f32 0.5, %v306_v2  ;;  %v321_v12 = vmul.f32 0.5, %v313_v5  ;;  %v401_v21 = vrot.slane %v387_v19, %v890_v6  ;;  %v402_v24 = vcombine.high %v394_v18, %v394_v18 }
  0x5e   :  { %v355_v15 = vrot.slane %v347_v11, %v890_v6 }
  0x5f   :  { %v348_v13 = vcombine.low %v320_v10, %v321_v12  ;;  %v403_v23 = vcombine.high %v401_v21, %v401_v21 }
  0x61   :  { %v362_v7 = vrot.slane %v348_v13, %v890_v6 }
  0x63   :  { %v363_v20 = vcombine.low %v355_v15, %v362_v7 }
  0x65   :  { %v367_v22 = vsub.f32 %v906_v14, %v363_v20 }
  0x67   :  { %v431_v8 = vcombine.low %v367_v22, %v367_v22  ;;  %v445_v9 = vrot.slane %v367_v22, %v890_v6 }
  0x69   :  { %v438_v25 = vrot.slane %v431_v8, %v890_v6  ;;  %v447_v27 = vcombine.high %v445_v9, %v445_v9  ;;  %v462_v28 = vsel %vm102_vm1, %v401_v21, %v445_v9 }
  0x6b   :  { %v446_v29 = vcombine.high %v438_v25, %v438_v25  ;;  %v463_v30 = vsel %vm102_vm1, %v403_v23, %v447_v27  ;;  %v460_v31 = vsel %vm102_vm1, %v394_v18, %v438_v25 }
  0x6c   :  { %675 = vmatprep.subr.mxu1 %v463_v30  ;;  %739 = vmatprep.mubr.f32.mxu1 %v463_v30 }
  0x6d   :  { %v461_v14 = vsel %vm102_vm1, %v402_v24, %v446_v29  ;;  %676 = vmatpush1.xpose.msra.mxu1 %v462_v28 }
  0x6e   :  { %605 = vmatprep.subr.mxu0 %v461_v14  ;;  %669 = vmatprep.mubr.f32.mxu0 %v461_v14 }
  0x6f   :  { %606 = vmatpush1.xpose.msra.mxu0 %v460_v31 }
  0x70   :  { %740 = vmatmul.mubr.f32.vlgmr.msra.gmra.mrb[2].mxu1 %v462_v28 }
  0x72   :  { %670 = vmatmul.mubr.f32.vlgmr.msra.gmra.mrb[2].mxu0 %v460_v31 }
 0x126   :  { %v601_v32 = vpop.f32.mrb[0].mxu1 }
 0x127   :  { %v603_v33 = vpop.f32.mrb[1].mxu1 }
 0x128   :  { %v531_v6 = vpop.f32.mrb[0].mxu0 }
 0x129   :  { %v533_v34 = vpop.f32.mrb[1].mxu0  ;;  %v602_v35 = vadd.f32 %v601_v32, %v531_v6 }
 0x143   :  { %v741_v36 = vpop.f32.mrb[2].mxu1 }
 0x144   :  { %v743_v37 = vpop.f32.mrb[3].mxu1 }
 0x145   :  { %v671_v38 = vpop.f32.mrb[2].mxu0 }
 0x146   :  { %v672_v39 = vadd.f32 %v671_v38, %v602_v35  ;;  %v673_v40 = vpop.f32.mrb[3].mxu0 }
 0x148   :  { %v742_v42 = vadd.f32 %v741_v36, %v672_v39 }
 0x14a   :  { %v745_v43 = vadd.f32 %v742_v42, %v464_v41 }
 0x14c   :  { %747 = vst.msk [vmem:[#allocation7] sm:$0xf] %vm52_vm0, %v745_v43 }
 0x14d   :  { %828 = shalt.err (!%p825_p6)
}
 0x14e   :  { %s829_s8 = scalar_lea.hbm %s997_s2, 64 }
 0x14f   :  { %p830_p7 = scmp.ne.s32.totalorder %s997_s2, %s829_s8  ;;  %p833_p8 = scmp.lt.u32.totalorder %s829_s8, %s997_s2 }
 0x151   :  { %p835_p9 = pnand %p833_p8, %p830_p7 }
 0x153   :  { %838 = shalt.err (!%p835_p9)
}
 0x154   :  { %757 = dma.vmem_to_hbm [thread:$0]  %s755_s4, 64, %s997_s2, [#allocation4]  }
 0x155   :  { %843 = dma.done.wait [#allocation4], 64  }
 0x156   :  { %844 = vsyncadd [#allocation4], 4294967232 }
 0x157   :  { %761 = vsyncpa [#allocation3], 1 }
 0x158   :  { %762 = vsyncpa [#allocation6], 1 }
 0x159   :  { %763 = vsyncpa [#allocation4], 1 }

</bundles_post_ra>
